<compile_context>
chip_gen: v7x
topology: tpu7x:2x2x1
jax: 0.10.0
libtpu: 0.0.40
codegen_flags: <defaults>
</compile_context>

<pallas_src>
import functools

import jax
import jax.numpy as jnp
from jax.experimental import pallas as pl
from jax.experimental.pallas import tpu as pltpu


def _round_up(x, m):
    return ((x + m - 1) // m) * m


def _pick_tile(d, candidates=(512, 256, 128)):
    """Largest lane-aligned tile that divides the (already 128-padded) dim."""
    for c in candidates:
        if d % c == 0:
            return c
    return d


@functools.lru_cache(maxsize=None)
def _vmem_budget_bytes():
    """Scoped-VMEM budget: ~75% of physical VMEM, 48 MiB fallback (v7x-safe)."""
    try:
        cap = int(pltpu.get_tpu_info().vmem_capacity_bytes)
        if cap <= 0:
            cap = 64 * 1024 * 1024
    except Exception:
        cap = 64 * 1024 * 1024
    return max(32 * 1024 * 1024, min(3 * cap // 4, 112 * 1024 * 1024))


# --------------------------------------------------------------------------- #
# Kernel
# --------------------------------------------------------------------------- #
def _elastic_highway_kernel(x_ref, w_ref, b_ref, o_ref, h_ref, *acc_refs,
                            tn, tk, resident):
    """Grid = (m, layer, n, k); layer/n/k sequential, m parallel.

    x_ref : (tm, D_pad)          padded input rows of this M tile
    w_ref : (L*nt*kt, tk, 3*tn)  whole packed slab   (resident=True)
            (1, tk, 3*tn)        one packed weight tile (streaming)
    b_ref : (L*nt, 1, 3*tn)      resident  /  (1, 1, 3*tn) streaming
    o_ref : (tm, D_pad)          final-layer output (resident across l, n, k)
    h_ref : (2, tm, D_pad)       ping-pong activation carry (compute dtype)
    acc_refs : ((tm, 3*tn) f32,) iff the K reduction is tiled (num_k > 1)
    """
    l = pl.program_id(1)
    n = pl.program_id(2)
    k = pl.program_id(3)
    num_layers = pl.num_programs(1)
    nt = pl.num_programs(2)
    num_k = pl.num_programs(3)

    # Layer 0: stage this M tile's (padded) input rows into ping buffer 0,
    # converting to the matmul/compute dtype exactly once per M tile.
    @pl.when((l == 0) & (n == 0) & (k == 0))
    def _():
        h_ref[0] = x_ref[...].astype(h_ref.dtype)

    p = l % 2                                  # layer l reads h[p], writes h[1-p]
    k_start = pl.multiple_of(k * tk, tk)
    n_start = pl.multiple_of(n * tn, tn)
    lhs = h_ref[p, :, pl.ds(k_start, tk)]      # already in compute dtype

    if resident:                               # static (trace-time) branch
        w_tile = w_ref[(l * nt + n) * num_k + k]   # (tk, 3*tn), contiguous slice
        b_tile = b_ref[l * nt + n]                 # (1, 3*tn)
    else:
        w_tile = w_ref[0]
        b_tile = b_ref[0]

    def epilogue(g_pre, nl_pre, lin_pre):
        # sigmoid lowers to a single EUP (tanh-based logistic) op on TPU.
        gate = jax.nn.sigmoid(g_pre)
        # gate*relu + (1-gate)*linear, with one fewer multiply.
        out = lin_pre + gate * (jnp.maximum(nl_pre, 0.0) - lin_pre)

        @pl.when(l < num_layers - 1)           # last layer's carry is dead work
        def _():
            h_ref[1 - p, :, pl.ds(n_start, tn)] = out.astype(h_ref.dtype)

        @pl.when(l == num_layers - 1)
        def _():
            o_ref[:, pl.ds(n_start, tn)] = out.astype(o_ref.dtype)

    if not acc_refs:
        # Untiled reduction (num_k == 1): no accumulator scratch round-trip.
        y = jnp.dot(lhs, w_tile, preferred_element_type=jnp.float32)
        y = y + b_tile.astype(jnp.float32)
        epilogue(y[:, :tn], y[:, tn:2 * tn], y[:, 2 * tn:])
    else:
        (acc_ref,) = acc_refs

        @pl.when(k == 0)
        def _():                               # seed with the bias: the
            acc_ref[...] = jnp.broadcast_to(   # epilogue bias add goes away
                b_tile.astype(jnp.float32), acc_ref.shape)

        acc_ref[...] += jnp.dot(lhs, w_tile,
                                preferred_element_type=jnp.float32)

        @pl.when(k == num_k - 1)
        def _():
            epilogue(acc_ref[:, :tn], acc_ref[:, tn:2 * tn],
                     acc_ref[:, 2 * tn:])


# --------------------------------------------------------------------------- #
# Parameter init / packing (wrapper-side layout plumbing)
# --------------------------------------------------------------------------- #
def init_elastic_highway_params(key, input_size, output_size, num_layers,
                                dtype=jnp.float32):
    """Same shapes as the PyTorch module; weights stored as [in, out]."""
    params = []
    for i in range(num_layers):
        d_in = output_size if i else input_size
        layer = {}
        for name in ("gate", "nonlinear", "linear"):
            key, kw, kb = jax.random.split(key, 3)
            bound = 1.0 / jnp.sqrt(d_in)
            w = jax.random.uniform(kw, (d_in, output_size), dtype,
                                   minval=-bound, maxval=bound)
            b = jax.random.uniform(kb, (1, output_size), dtype,
                                   minval=-bound, maxval=bound)
            layer[name] = (w, b)
        params.append(layer)
    return params


def pack_elastic_highway_params(params, input_size, output_size,
                                compute_dtype=None):
    """Pack per-layer branch weights into a kernel-friendly contiguous slab.

    Weights:  [L * nt * kt, t, 3*t]  (n-tile major, k-tile minor per layer; the
              3*t columns of each row group are [gate | relu | linear] for that
              n tile) -> every kernel weight block is one fully-linear DMA.
    Biases :  [L * nt, 1, 3*t]
    Zero-padding of both feature dims keeps the math exact (padded activation
    columns stay exactly 0 across layers).  `compute_dtype=jnp.bfloat16` packs
    bf16 operands for ~3x MXU throughput (accumulation stays f32 in-kernel).
    """
    d_pad = _round_up(max(input_size, output_size), 128)
    t = _pick_tile(d_pad)
    nt = kt = d_pad // t

    def pad_w(w):
        return jnp.pad(w, ((0, d_pad - w.shape[0]), (0, d_pad - w.shape[1])))

    def pad_b(b):
        return jnp.pad(b, ((0, 0), (0, d_pad - b.shape[1])))

    ws, bs = [], []
    for layer in params:
        wg, bg = layer["gate"]
        wn, bn = layer["nonlinear"]
        wl, bl = layer["linear"]
        w3 = jnp.stack([pad_w(wg), pad_w(wn), pad_w(wl)], axis=0)   # (3, K, N)
        w3 = (w3.reshape(3, kt, t, nt, t)
                 .transpose(3, 1, 2, 0, 4)      # (ntile, ktile, krow, branch, col)
                 .reshape(nt * kt, t, 3 * t))
        b3 = jnp.stack([pad_b(bg), pad_b(bn), pad_b(bl)], axis=0)   # (3, 1, N)
        b3 = (b3.reshape(3, 1, nt, t)
                 .transpose(2, 1, 0, 3)
                 .reshape(nt, 1, 3 * t))
        ws.append(w3)
        bs.append(b3)
    w_packed = jnp.concatenate(ws, axis=0)
    b_packed = jnp.concatenate(bs, axis=0)
    if compute_dtype is not None:
        w_packed = w_packed.astype(compute_dtype)
        b_packed = b_packed.astype(compute_dtype)
    return w_packed, b_packed


# --------------------------------------------------------------------------- #
# Forward
# --------------------------------------------------------------------------- #
@functools.partial(jax.jit, static_argnames=("output_size",))
def elastic_highway_forward(x, w_packed, b_packed, *, output_size):
    B, d_in = x.shape
    G, tk, three_tn = w_packed.shape            # G = L * nt * kt
    LNT = b_packed.shape[0]                     # L * nt
    tn = three_tn // 3
    kt = G // LNT
    d_pad = kt * tk
    nt = d_pad // tn
    L = LNT // nt

    x_bytes = x.dtype.itemsize
    w_bytes = w_packed.dtype.itemsize           # compute dtype == packed dtype
    b_pad = _round_up(B, 8)

    budget = _vmem_budget_bytes()
    margin = 4 * 1024 * 1024

    # ---- weight residency decision (double-buffered whole slab vs streaming)
    slab_bytes = (w_packed.size + b_packed.size) * w_bytes
    w_vmem_resident = 2 * slab_bytes
    w_vmem_stream = 2 * (tk * 3 * tn + 3 * tn) * w_bytes

    def act_vmem(tm):
        return (4 * tm * d_pad * x_bytes        # x + out blocks, double-buffered
                + 2 * tm * d_pad * w_bytes      # h ping-pong carry
                + (tm * 3 * tn * 4 if kt > 1 else 0))   # f32 accumulator

    resident = (w_vmem_resident + act_vmem(min(b_pad, 128)) + margin) <= budget

    # ---- batch tile selection -------------------------------------------- #
    w_vmem = w_vmem_resident if resident else w_vmem_stream
    per_row = (4 * d_pad * x_bytes + 2 * d_pad * w_bytes
               + (3 * tn * 4 if kt > 1 else 0))
    tm_cap = max(8, ((budget - w_vmem - margin) // per_row) // 8 * 8)
    # Streaming weights: tm as big as VMEM allows (weights are re-fetched once
    # per M tile).  Resident weights: modest tm, and >= 2 M tiles when the
    # batch allows so both v7x TensorCores get work (m axis is "parallel").
    tm = min(b_pad, (256 if resident else 512), tm_cap)
    if resident and b_pad > 16 and b_pad <= tm:
        tm = max(8, _round_up((b_pad + 1) // 2, 8))
    m_pad = _round_up(b_pad, tm)

    x_p = jnp.pad(x, ((0, m_pad - B), (0, d_pad - d_in)))

    grid = (m_pad // tm, L, nt, kt)

    if resident:
        # Whole slab VMEM-resident: constant block index => DMA'd exactly once.
        w_spec = pl.BlockSpec((G, tk, 3 * tn), lambda m, l, n, k: (0, 0, 0))
        b_spec = pl.BlockSpec((LNT, 1, 3 * tn), lambda m, l, n, k: (0, 0, 0))
    else:
        # Stream one contiguous (tk, 3*tn) tile per (layer, n, k) step.
        w_spec = pl.BlockSpec(
            (1, tk, 3 * tn), lambda m, l, n, k: ((l * nt + n) * kt + k, 0, 0))
        b_spec = pl.BlockSpec(
            (1, 1, 3 * tn), lambda m, l, n, k: (l * nt + n, 0, 0))

    scratch = [pltpu.VMEM((2, tm, d_pad), w_packed.dtype)]   # activation carry
    if kt > 1:
        scratch.append(pltpu.VMEM((tm, 3 * tn), jnp.float32))  # accumulator

    kernel = functools.partial(_elastic_highway_kernel,
                               tn=tn, tk=tk, resident=resident)

    out = pl.pallas_call(
        kernel,
        out_shape=jax.ShapeDtypeStruct((m_pad, d_pad), x.dtype),
        grid_spec=pltpu.PrefetchScalarGridSpec(
            num_scalar_prefetch=0,
            grid=grid,
            in_specs=[
                pl.BlockSpec((tm, d_pad), lambda m, l, n, k: (m, 0)),   # x
                w_spec,
                b_spec,
            ],
            out_specs=pl.BlockSpec((tm, d_pad), lambda m, l, n, k: (m, 0)),
            scratch_shapes=scratch,
        ),
        compiler_params=pltpu.CompilerParams(
            dimension_semantics=("parallel", "arbitrary", "arbitrary",
                                 "arbitrary"),
            vmem_limit_bytes=budget,
        ),
    )(x_p, w_packed, b_packed)

    return out[:B, :output_size]


def elastic_highway_reference(x, params):
    """Pure-JAX reference (mirrors the PyTorch forward)."""
    hp = jax.lax.Precision.HIGHEST
    for layer in params:
        wg, bg = layer["gate"]
        wn, bn = layer["nonlinear"]
        wl, bl = layer["linear"]
        gate = jax.nn.sigmoid(jnp.dot(x, wg, precision=hp) + bg)
        nonlinear = jnp.maximum(jnp.dot(x, wn, precision=hp) + bn, 0.0)
        linear = jnp.dot(x, wl, precision=hp) + bl
        x = gate * nonlinear + (1.0 - gate) * linear
    return x


if __name__ == "__main__":
    key = jax.random.PRNGKey(0)

    def run_case(key, batch, input_size, output_size, num_layers, atol, rtol):
        key, kx, kp = jax.random.split(key, 3)
        x = jax.random.normal(kx, (batch, input_size), dtype=jnp.float32)
        params = init_elastic_highway_params(kp, input_size, output_size,
                                             num_layers)
        w_packed, b_packed = pack_elastic_highway_params(
            params, input_size, output_size)
        out = elastic_highway_forward(x, w_packed, b_packed,
                                      output_size=output_size)
        out = jax.block_until_ready(out)
        ref = elastic_highway_reference(x, params)
        assert out.shape == (batch, output_size)
        err = float(jnp.max(jnp.abs(out - ref)))
        assert jnp.allclose(out, ref, atol=atol, rtol=rtol), (
            f"max abs err {err} (batch={batch}, in={input_size}, "
            f"out={output_size}, L={num_layers})")
        return key

    # Tiny shape matching the module docstring ([batch, size] activations):
    # single K/N tile, resident weights, no accumulator scratch.
    key = run_case(key, batch=4, input_size=48, output_size=32, num_layers=3,
                   atol=1e-4, rtol=1e-4)
    # Exercises the multi-tile paths: several M / N / K tiles, f32 accumulator
    # seeded with the bias, padded feature dims, >= 2 M tiles (megacore).
    key = run_case(key, batch=20, input_size=300, output_size=160,
                   num_layers=2, atol=2e-4, rtol=2e-4)

    print("KERNEL_OK")
</pallas_src>

<mosaic_0001>
module attributes {stable_mosaic.version = 11 : i64} {
  func.func @_elastic_highway_kernel(%arg0: i32, %arg1: i32, %arg2: i32, %arg3: i32, %arg4: memref<8x128xf32, #tpu.memory_space<vmem>>, %arg5: memref<3x128x384xf32, #tpu.memory_space<vmem>>, %arg6: memref<3x1x384xf32, #tpu.memory_space<vmem>>, %arg7: memref<8x128xf32, #tpu.memory_space<vmem>>, %arg8: memref<2x8x128xf32, #tpu.memory_space<vmem>>) attributes {dimension_semantics = [#tpu.dimension_semantics<parallel>, #tpu.dimension_semantics<arbitrary>, #tpu.dimension_semantics<arbitrary>, #tpu.dimension_semantics<arbitrary>], iteration_bounds = array<i64: 1, 3, 1, 1>, scalar_prefetch = 0 : i64, scratch_operands = 1 : i64, tpu.core_type = #tpu.core_type<tc>, window_params = [{transform_indices = @transform_0, window_bounds = array<i64: 8, 128>}, {pipeline_mode = #tpu.pipeline_mode<synchronous>, transform_indices = @transform_1, window_bounds = array<i64: 3, 128, 384>}, {pipeline_mode = #tpu.pipeline_mode<synchronous>, transform_indices = @transform_2, window_bounds = array<i64: 3, 1, 384>}, {transform_indices = @transform_3, window_bounds = array<i64: 8, 128>}]} {
    %c0_i32 = arith.constant 0 : i32
    %0 = arith.cmpi eq, %arg1, %c0_i32 : i32
    %c0_i32_0 = arith.constant 0 : i32
    %1 = arith.cmpi eq, %arg2, %c0_i32_0 : i32
    %2 = arith.andi %0, %1 : i1
    %c0_i32_1 = arith.constant 0 : i32
    %3 = arith.cmpi eq, %arg3, %c0_i32_1 : i32
    %4 = arith.andi %2, %3 : i1
    %5 = arith.extui %4 : i1 to i32
    %c0_i32_2 = arith.constant 0 : i32
    %6 = arith.cmpi ne, %5, %c0_i32_2 : i32
    scf.if %6 {
      %c0_21 = arith.constant 0 : index
      %c0_22 = arith.constant 0 : index
      %59 = vector.load %arg4[%c0_21, %c0_22] : memref<8x128xf32, #tpu.memory_space<vmem>>, vector<8x128xf32>
      %c0_23 = arith.constant 0 : index
      %c0_24 = arith.constant 0 : index
      %c0_25 = arith.constant 0 : index
      %60 = vector.load %arg8[%c0_23, %c0_24, %c0_25] : memref<2x8x128xf32, #tpu.memory_space<vmem>>, vector<1x8x128xf32>
      %61 = vector.shape_cast %60 : vector<1x8x128xf32> to vector<8x128xf32>
      %62 = vector.shape_cast %59 : vector<8x128xf32> to vector<1x8x128xf32>
      tpu.vector_store %arg8[%c0_23, %c0_24, %c0_25], %62 {strides = array<i32>} : memref<2x8x128xf32, #tpu.memory_space<vmem>>, vector<1x8x128xf32>,
    } else {
    }
    %c2_i32 = arith.constant 2 : i32
    %c0_i32_3 = arith.constant 0 : i32
    %7 = arith.cmpi eq, %c2_i32, %c0_i32_3 : i32
    %c1_i32 = arith.constant 1 : i32
    %8 = arith.select %7, %c1_i32, %c2_i32 : i32
    %9 = arith.remsi %arg1, %8 : i32
    %c0_i32_4 = arith.constant 0 : i32
    %10 = arith.cmpi ne, %9, %c0_i32_4 : i32
    %c0_i32_5 = arith.constant 0 : i32
    %11 = arith.cmpi slt, %9, %c0_i32_5 : i32
    %c0_i32_6 = arith.constant 0 : i32
    %12 = arith.cmpi slt, %8, %c0_i32_6 : i32
    %13 = arith.xori %11, %12 : i1
    %14 = arith.andi %13, %10 : i1
    %15 = arith.addi %9, %8 : i32
    %16 = arith.select %14, %15, %9 : i32
    %c128_i32 = arith.constant 128 : i32
    %17 = arith.muli %arg3, %c128_i32 : i32
    %18 = tpu.assume_multiple %17, 128 : i32
    %c128_i32_7 = arith.constant 128 : i32
    %19 = arith.muli %arg2, %c128_i32_7 : i32
    %20 = tpu.assume_multiple %19, 128 : i32
    %21 = arith.index_cast %16 : i32 to index
    %c0 = arith.constant 0 : index
    %22 = arith.index_cast %18 : i32 to index
    %23 = vector.load %arg8[%21, %c0, %22] : memref<2x8x128xf32, #tpu.memory_space<vmem>>, vector<1x8x128xf32>
    %24 = vector.shape_cast %23 : vector<1x8x128xf32> to vector<8x128xf32>
    %c1_i32_8 = arith.constant 1 : i32
    %25 = arith.muli %arg1, %c1_i32_8 : i32
    %26 = arith.addi %25, %arg2 : i32
    %c1_i32_9 = arith.constant 1 : i32
    %27 = arith.muli %26, %c1_i32_9 : i32
    %28 = arith.addi %27, %arg3 : i32
    %29 = arith.index_cast %28 : i32 to index
    %c0_10 = arith.constant 0 : index
    %c0_11 = arith.constant 0 : index
    %30 = vector.load %arg5[%29, %c0_10, %c0_11] : memref<3x128x384xf32, #tpu.memory_space<vmem>>, vector<1x128x384xf32>
    %31 = vector.shape_cast %30 : vector<1x128x384xf32> to vector<128x384xf32>
    %c1_i32_12 = arith.constant 1 : i32
    %32 = arith.muli %arg1, %c1_i32_12 : i32
    %33 = arith.addi %32, %arg2 : i32
    %34 = arith.index_cast %33 : i32 to index
    %c0_13 = arith.constant 0 : index
    %c0_14 = arith.constant 0 : index
    %35 = vector.load %arg6[%34, %c0_13, %c0_14] : memref<3x1x384xf32, #tpu.memory_space<vmem>>, vector<1x1x384xf32>
    %36 = vector.shape_cast %35 : vector<1x1x384xf32> to vector<1x384xf32>
    %cst = arith.constant dense<0.000000e+00> : vector<8x384xf32>
    %37 = tpu.matmul %24, %31, %cst {dimension_numbers = #tpu.dot_dimension_numbers<[1], [0], [0], [1], [0, 0, 1, 1], [], []>} : vector<8x128xf32>, vector<128x384xf32>, vector<8x384xf32> -> vector<8x384xf32>
    %38 = vector.broadcast %36 : vector<1x384xf32> to vector<8x384xf32>
    %39 = arith.addf %37, %38 : vector<8x384xf32>
    %40 = vector.extract_strided_slice %39 {offsets = [0, 0], sizes = [8, 128], strides = [1, 1]} : vector<8x384xf32> to vector<8x128xf32>
    %41 = vector.extract_strided_slice %39 {offsets = [0, 128], sizes = [8, 128], strides = [1, 1]} : vector<8x384xf32> to vector<8x128xf32>
    %42 = vector.extract_strided_slice %39 {offsets = [0, 256], sizes = [8, 128], strides = [1, 1]} : vector<8x384xf32> to vector<8x128xf32>
    %43 = arith.negf %40 : vector<8x128xf32>
    %44 = math.exp %43 : vector<8x128xf32>
    %cst_15 = arith.constant 1.000000e+00 : f32
    %45 = vector.broadcast %cst_15 : f32 to vector<8x128xf32>
    %46 = arith.addf %45, %44 : vector<8x128xf32>
    %47 = arith.divf %45, %46 : vector<8x128xf32>
    %cst_16 = arith.constant 0.000000e+00 : f32
    %48 = vector.broadcast %cst_16 : f32 to vector<8x128xf32>
    %49 = arith.maximumf %41, %48 : vector<8x128xf32>
    %50 = arith.subf %49, %42 : vector<8x128xf32>
    %51 = arith.mulf %47, %50 : vector<8x128xf32>
    %52 = arith.addf %42, %51 : vector<8x128xf32>
    %c2_i32_17 = arith.constant 2 : i32
    %53 = arith.cmpi slt, %arg1, %c2_i32_17 : i32
    %54 = arith.extui %53 : i1 to i32
    %c0_i32_18 = arith.constant 0 : i32
    %55 = arith.cmpi ne, %54, %c0_i32_18 : i32
    scf.if %55 {
      %c1_i32_21 = arith.constant 1 : i32
      %59 = arith.subi %c1_i32_21, %16 : i32
      %60 = arith.index_cast %59 : i32 to index
      %c0_22 = arith.constant 0 : index
      %61 = arith.index_cast %20 : i32 to index
      %62 = vector.load %arg8[%60, %c0_22, %61] : memref<2x8x128xf32, #tpu.memory_space<vmem>>, vector<1x8x128xf32>
      %63 = vector.shape_cast %62 : vector<1x8x128xf32> to vector<8x128xf32>
      %64 = vector.shape_cast %52 : vector<8x128xf32> to vector<1x8x128xf32>
      tpu.vector_store %arg8[%60, %c0_22, %61], %64 {strides = array<i32>} : memref<2x8x128xf32, #tpu.memory_space<vmem>>, vector<1x8x128xf32>,
    } else {
    }
    %c2_i32_19 = arith.constant 2 : i32
    %56 = arith.cmpi eq, %arg1, %c2_i32_19 : i32
    %57 = arith.extui %56 : i1 to i32
    %c0_i32_20 = arith.constant 0 : i32
    %58 = arith.cmpi ne, %57, %c0_i32_20 : i32
    scf.if %58 {
      %c0_21 = arith.constant 0 : index
      %59 = arith.index_cast %20 : i32 to index
      %60 = vector.load %arg7[%c0_21, %59] : memref<8x128xf32, #tpu.memory_space<vmem>>, vector<8x128xf32>
      tpu.vector_store %arg7[%c0_21, %59], %52 {strides = array<i32>} : memref<8x128xf32, #tpu.memory_space<vmem>>, vector<8x128xf32>,
    } else {
    }
    return
  }
  func.func @transform_0(%arg0: i32, %arg1: i32, %arg2: i32, %arg3: i32) -> (i32, i32) {
    %c0_i32 = arith.constant 0 : i32
    %c0_i32_0 = arith.constant 0 : i32
    return %arg0, %c0_i32 : i32, i32
  }
  func.func @transform_1(%arg0: i32, %arg1: i32, %arg2: i32, %arg3: i32) -> (i32, i32, i32) {
    %c0_i32 = arith.constant 0 : i32
    %c0_i32_0 = arith.constant 0 : i32
    %c0_i32_1 = arith.constant 0 : i32
    %c0_i32_2 = arith.constant 0 : i32
    return %c0_i32, %c0_i32_0, %c0_i32_1 : i32, i32, i32
  }
  func.func @transform_2(%arg0: i32, %arg1: i32, %arg2: i32, %arg3: i32) -> (i32, i32, i32) {
    %c0_i32 = arith.constant 0 : i32
    %c0_i32_0 = arith.constant 0 : i32
    %c0_i32_1 = arith.constant 0 : i32
    %c0_i32_2 = arith.constant 0 : i32
    return %c0_i32, %c0_i32_0, %c0_i32_1 : i32, i32, i32
  }
  func.func @transform_3(%arg0: i32, %arg1: i32, %arg2: i32, %arg3: i32) -> (i32, i32) {
    %c0_i32 = arith.constant 0 : i32
    %c0_i32_0 = arith.constant 0 : i32
    return %arg0, %c0_i32 : i32, i32
  }
}

</mosaic_0001>

<bundles_post_ra>
// kernel: elastic_highway_forward.1
= control target key start
LH: loop header
LB: loop body
LE: loop exit
PB: predicated region body
PF: predicated region fallthrough
CT: control target
= control target key end

     0   :  { %8 = vsyncpa [#allocation4], 0  ;;  %s831_s12 = smov 0   ;;  %s833_s13 = smov 0   ;;  %s990_s0 = inlined_call_operand.vmem [shape: f32[8,128], index: 0, kind: input, shape index: {}]   ;;  %s991_s1 = inlined_call_operand.hbm [shape: f32[3,128,384], index: 1, kind: input, shape index: {}]   ;;  %s992_s2 = inlined_call_operand.vmem [shape: f32[3,1,384], index: 2, kind: input, shape index: {}]   ;;  %s993_s3 = inlined_call_operand.vmem [shape: f32[8,128], index: 3, kind: output, shape index: {}]  }
   0x1   :  { %s835_s14 = smov 0  }
   0x2 LB: > { %s574_s15 = sadd.s32 4294967295, %s803_s14   ;;  %s36_s16 = sadd.s32 1, %s799_s13  ;;  %s803_s14 = sphi %s835_s14, %s14_s14   ;;  %s799_s13 = sphi %s833_s13, %s1003_s13   ;;  %s795_s12 = sphi %s831_s12, %s1002_s12  }
   0x3   : > { %p38_p0 = scmp.ge.s32.totalorder %s36_s16, 3  ;;  %p575_p1 = scmp.ge.s32.totalorder %s803_s14, 1 }
   0x4   : > { %p139_p2 = scmp.lt.s32.totalorder %s803_s14, 4  ;;  %p856_p4 = scmp.eq.s32.totalorder %s574_s15, 0 }
   0x5   : > { %s1005_s16 = smov (%p38_p0, %s36_s16), 0  ;;  %s805_s19 = smov [#allocation3]  }
   0x6   : > { %p852_p3 = pnand %p575_p1, %p139_p2  ;;  %s158_s20 = sshll.u32 %s805_s19, 4  ;;  %s159_s20 = int_to_ptr.vmem [resolvable:$true] %s158_s20 }
   0x7   : > { %s998_s18 = scalar_select %p856_p4, 1, 0 }
   0x8   : > { %s997_s17 = scalar_select %p852_p3, 1, 0 }
   0x9   : > { %p709_p5 = pneg %p852_p3  ;;  %s749_s24 = scalar_lea.hbm %s991_s1, 18432 }
   0xa   : > { %p750_p7 = scmp.ne.s32.totalorder %s991_s1, %s749_s24  ;;  %p756_p11 = scmp.lt.u32.totalorder %s749_s24, %s991_s1 }
   0xb   : > { %p864_p6 = pnand %p856_p4, %p709_p5 }
   0xd   : > { %p751_p8 = pneg %p864_p6 }
   0xf   : > { %p752_p9 = pnand %p751_p8, %p750_p7 }
  0x11   : > { %p753_p10 = pneg %p752_p9 }
  0x13   : > { %p758_p12 = pnand %p756_p11, %p753_p10 }
  0x15   : > { %761 = shalt.err (!%p758_p12)
}
  0x16   : > { %s762_s29 = scalar_lea.vmem %s159_s20, 18432  ;;  %p770_p2 = scmp.lt.s32.totalorder %s159_s20, %s159_s20 }
  0x17   : > { %p763_p13 = scmp.ne.s32.totalorder %s159_s20, %s762_s29  ;;  %p771_p5 = scmp.lt.s32.totalorder %s762_s29, %s762_s29 }
  0x19   : > { %p765_p0 = pnand %p763_p13, %p751_p8  ;;  %p772_p4 = por %p771_p5, %p770_p2 }
  0x1b   : > { %p766_p1 = pneg %p765_p0 }
  0x1d   : > { %p773_p3 = pnand %p772_p4, %p766_p1 }
  0x1f   : > { %776 = shalt.err (!%p773_p3)
}
  0x20   : > { %s806_s30 = smov 384   ;;  %s807_s4 = smov 24  }
  0x21   : > { %712 = dma.hbm_to_vmem [thread:$0]  (!%p864_p6), %s991_s1, 18432, %s159_s20, [#allocation4], %s806_s30, %s806_s30, %s807_s4  }
  0x22   : > { %p1000_p7 = scmp.ne.s32.totalorder %s997_s17, 0 }
  0x23   : > { %p1001_p9 = scmp.ne.s32.totalorder (!%p1000_p7), %s998_s18, 0 }
  0x24   : > { %177 = sbr.rel (%p1000_p7) target bundleno = 345 (0x159), region = 32 }
  0x2b   : > { %790 = dma.done.wait (%p1001_p9), [#allocation4], 18432  }
  0x2c   : > { %792 = vsyncadd (%p1001_p9), [#allocation4], 4294948864  ;;  %p207_p4 = scmp.eq.s32.totalorder %s795_s12, 0 }
  0x2d   : > { %v216_v0 = vld [vmem:[%s990_s0] sm:$0xff] (%p207_p4) }
  0x2e   : > { %215 = sbr.rel (!%p207_p4) target bundleno = 53 (0x35), region = 40  ;;  %217 = vst [vmem:[#allocation2] sm:$0xff] (%p207_p4), %v216_v0 }
  0x35 PF: > { %s596_s9 = smul.u32 384, %s795_s12  ;;  %v808_v1 = vmov 0.0|0.0   ;;  %v809_v2 = vmov 0.0   ;;  %vm810_vm0 = vmmov 0   ;;  %s219_s11 = ssub.s32 0, %s795_s12 }
  0x36   : > { %681 = vmatprep.subr.bf16.mxu1 %v808_v1  ;;  %374 = vmatprep.mubr.f32.mxu0 %v809_v2  ;;  %s917_s15 = smin.u32 %s795_s12, %s219_s11  ;;  %p218_p3 = scmp.lt.s32.totalorder %s795_s12, 0 }
  0x37   : > { %646 = vmatprep.mubr.msk.f32.mxu1 %vm810_vm0, %v809_v2  ;;  %s896_s10 = scalar_lea.vmem [#allocation3], %s596_s9  ;;  %s221_s17 = sand.u32 1, %s917_s15  }
  0x38   : > { %v244_v3 = vld [vmem:[%s896_s10 + $0x8] sm:$0xff]  ;;  %v247_v4 = vld [vmem:[%s896_s10 + $0x20] sm:$0xff]  ;;  %v246_v7 = vld [vmem:[%s896_s10 + $0x18] sm:$0xff]  ;;  %s222_s18 = ssub.s32 0, %s221_s17  ;;  %s291_s22 = smul.u32 3, %s795_s12 }
  0x39   : > { %v243_v5 = vld [vmem:[%s896_s10] sm:$0xff]  ;;  %v649_v6 = vpack.c.bf16 %v247_v4, %v244_v3  ;;  %v250_v8 = vld [vmem:[%s896_s10 + $0x38] sm:$0xff]  ;;  %v253_v9 = vld [vmem:[%s896_s10 + $0x50] sm:$0xff]  ;;  %s1007_s18 = smov (!%p218_p3, %s222_s18), %s221_s17  ;;  %p588_p8 = scmp.ge.s32.totalorder %s795_s12, 2 }
  0x3a   : > { %v651_v10 = vpack.c.bf16 %v246_v7, %v243_v5  ;;  %v653_v11 = vpack.c.bf16 %v253_v9, %v250_v8  ;;  %v245_v12 = vld [vmem:[%s896_s10 + $0x10] sm:$0xff]  ;;  %v248_v13 = vld [vmem:[%s896_s10 + $0x28] sm:$0xff]  ;;  %v259_v18 = vld [vmem:[%s896_s10 + $0x80] sm:$0xff]  ;;  %p584_p6 = scmp.lt.s32.totalorder %s1007_s18, 0  ;;  %s228_s19 = sadd.s32 2, %s1007_s18 }
  0x3b   : > { %v249_v14 = vld [vmem:[%s896_s10 + $0x30] sm:$0xff]  ;;  %650 = vmatprep.subr.bf16.mxu0 %v649_v6  ;;  %v682_v15 = vpack.c.bf16 %v248_v13, %v245_v12  ;;  %v252_v16 = vld [vmem:[%s896_s10 + $0x48] sm:$0xff]  ;;  %v251_v20 = vld [vmem:[%s896_s10 + $0x40] sm:$0xff]  ;;  %v295_v13 = vlaneseq  ;;  %s292_s25 = scalar_lea.vmem %s992_s2, %s291_s22 }
  0x3c   : > { %v256_v17 = vld [vmem:[%s896_s10 + $0x68] sm:$0xff]  ;;  %652 = vmatpush1.bf16.msra.mxu0 %v651_v10  ;;  %v655_v19 = vpack.c.bf16 %v252_v16, %v249_v14  ;;  %v254_v21 = vld [vmem:[%s896_s10 + $0x58] sm:$0xff]  ;;  %v255_v24 = vld [vmem:[%s896_s10 + $0x60] sm:$0xff]  ;;  %s1009_s19 = smov (!%p584_p6, %s228_s19), %s1007_s18 }
  0x3d   : > { %654 = vmatprep.subr.bf16.mxu0 %v653_v11  ;;  %683 = vmatpush3.bf16.msra.mxu1 %v682_v15  ;;  %v657_v22 = vpack.c.bf16 %v259_v18, %v256_v17  ;;  %v685_v23 = vpack.c.bf16 %v254_v21, %v251_v20  ;;  %v258_v25 = vld [vmem:[%s896_s10 + $0x78] sm:$0xff]  ;;  %v265_v27 = vld [vmem:[%s896_s10 + $0xb0] sm:$0xff]  ;;  %v260_v29 = vld [vmem:[%s896_s10 + $0x88] sm:$0xff]  ;;  %s585_s20 = sshll.u32 %s1009_s19, 3  ;;  %v296_v14 = vshrl.u32 %v295_v13, 7  ;;  %s465_s26 = ssub.s32 (!%p588_p8), 1, %s1009_s19 }
  0x3e   : > { %v262_v26 = vld [vmem:[%s896_s10 + $0x98] sm:$0xff]  ;;  %684 = vmatprep.subr.bf16.mxu1 %v808_v1  ;;  %v257_v28 = vld [vmem:[%s896_s10 + $0x70] sm:$0xff]  ;;  %v659_v30 = vpack.c.bf16 %v258_v25, %v255_v24  ;;  %v264_v34 = vld [vmem:[%s896_s10 + $0xa8] sm:$0xff]  ;;  %s236_s21 = scalar_lea.vmem [#allocation2], %s585_s20  ;;  %s589_s27 = sshll.u32 (!%p588_p8), %s465_s26, 3 }
  0x3f   : > { %v661_v31 = vpack.c.bf16 %v265_v27, %v262_v26  ;;  %v688_v32 = vpack.c.bf16 %v260_v29, %v257_v28  ;;  %v261_v33 = vld [vmem:[%s896_s10 + $0x90] sm:$0xff]  ;;  %v268_v35 = vld [vmem:[%s896_s10 + $0xc8] sm:$0xff]  ;;  %v271_v36 = vld [vmem:[%s896_s10 + $0xe0] sm:$0xff]  ;;  %v297_v15 = vsub.s32 0, %v296_v14  ;;  %v301_v17 = vsub.s32 1, %v296_v14  ;;  %s470_s28 = scalar_lea.vmem (!%p588_p8), [#allocation2], %s589_s27 }
  0x40   : > { %656 = vmatpush1.bf16.msra.mxu0 %v655_v19  ;;  %v263_v37 = vld [vmem:[%s896_s10 + $0xa0] sm:$0xff]  ;;  %v266_v38 = vld [vmem:[%s896_s10 + $0xb8] sm:$0xff]  ;;  %v663_v39 = vpack.c.bf16 %v264_v34, %v261_v33  ;;  %v665_v40 = vpack.c.bf16 %v271_v36, %v268_v35  ;;  %v277_v45 = vld [vmem:[%s896_s10 + $0x110] sm:$0xff]  ;;  %v305_v18 = vsub.s32 2, %v296_v14 }
  0x41   : > { %658 = vmatprep.subr.bf16.mxu0 %v657_v22  ;;  %686 = vmatpush3.bf16.msra.mxu1 %v685_v23  ;;  %v691_v41 = vpack.c.bf16 %v266_v38, %v263_v37  ;;  %v267_v42 = vld [vmem:[%s896_s10 + $0xc0] sm:$0xff]  ;;  %v270_v43 = vld [vmem:[%s896_s10 + $0xd8] sm:$0xff]  ;;  %v269_v46 = vld [vmem:[%s896_s10 + $0xd0] sm:$0xff] }
  0x42   : > { %687 = vmatprep.subr.bf16.mxu1 %v808_v1  ;;  %v274_v44 = vld [vmem:[%s896_s10 + $0xf8] sm:$0xff]  ;;  %v272_v47 = vld [vmem:[%s896_s10 + $0xe8] sm:$0xff]  ;;  %v667_v48 = vpack.c.bf16 %v270_v43, %v267_v42  ;;  %v273_v51 = vld [vmem:[%s896_s10 + $0xf0] sm:$0xff] }
  0x43   : > { %v669_v49 = vpack.c.bf16 %v277_v45, %v274_v44  ;;  %v694_v50 = vpack.c.bf16 %v272_v47, %v269_v46  ;;  %v276_v52 = vld [vmem:[%s896_s10 + $0x108] sm:$0xff]  ;;  %v283_v54 = vld [vmem:[%s896_s10 + $0x140] sm:$0xff]  ;;  %v278_v56 = vld [vmem:[%s896_s10 + $0x118] sm:$0xff] }
  0x44   : > { %660 = vmatpush1.bf16.msra.mxu0 %v659_v30  ;;  %v280_v53 = vld [vmem:[%s896_s10 + $0x128] sm:$0xff]  ;;  %v275_v55 = vld [vmem:[%s896_s10 + $0x100] sm:$0xff]  ;;  %v671_v57 = vpack.c.bf16 %v276_v52, %v273_v51  ;;  %v282_v61 = vld [vmem:[%s896_s10 + $0x138] sm:$0xff] }
  0x45   : > { %662 = vmatprep.subr.bf16.mxu0 %v661_v31  ;;  %689 = vmatpush3.bf16.msra.mxu1 %v688_v32  ;;  %v673_v58 = vpack.c.bf16 %v283_v54, %v280_v53  ;;  %v697_v59 = vpack.c.bf16 %v278_v56, %v275_v55  ;;  %v279_v60 = vld [vmem:[%s896_s10 + $0x120] sm:$0xff]  ;;  %v286_v62 = vld [vmem:[%s896_s10 + $0x158] sm:$0xff]  ;;  %v289_v63 = vld [vmem:[%s896_s10 + $0x170] sm:$0xff] }
  0x46   : > { %690 = vmatprep.subr.bf16.mxu1 %v808_v1  ;;  %v281_v0 = vld [vmem:[%s896_s10 + $0x130] sm:$0xff]  ;;  %v284_v2 = vld [vmem:[%s896_s10 + $0x148] sm:$0xff]  ;;  %v675_v3 = vpack.c.bf16 %v282_v61, %v279_v60  ;;  %v677_v4 = vpack.c.bf16 %v289_v63, %v286_v62  ;;  %v287_v8 = vld [vmem:[%s896_s10 + $0x160] sm:$0xff] }
  0x47   : > { %v700_v5 = vpack.c.bf16 %v284_v2, %v281_v0  ;;  %v285_v6 = vld [vmem:[%s896_s10 + $0x150] sm:$0xff]  ;;  %v288_v7 = vld [vmem:[%s896_s10 + $0x168] sm:$0xff]  ;;  %v290_v9 = vld [vmem:[%s896_s10 + $0x178] sm:$0xff] }
  0x48   : > { %664 = vmatpush1.bf16.msra.mxu0 %v663_v39  ;;  %v679_v10 = vpack.c.bf16 %v288_v7, %v285_v6  ;;  %v703_v11 = vpack.c.bf16 %v290_v9, %v287_v8  ;;  %v237_v12 = vld [vmem:[%s236_s21] sm:$0xff] }
  0x49   : > { %666 = vmatprep.subr.bf16.mxu0 %v665_v40  ;;  %692 = vmatpush3.bf16.msra.mxu1 %v691_v41  ;;  %v293_v16 = vld [vmem:[%s292_s25] sm:$0x7] }
  0x4a   : > { %693 = vmatprep.subr.bf16.mxu1 %v808_v1  ;;  %v298_v19 = vrot.slane %v293_v16, %v297_v15  ;;  %v302_v20 = vrot.slane %v293_v16, %v301_v17 }
  0x4c   : > { %668 = vmatpush1.bf16.msra.mxu0 %v667_v48 }
  0x4d   : > { %670 = vmatprep.subr.bf16.mxu0 %v669_v49  ;;  %695 = vmatpush3.bf16.msra.mxu1 %v694_v50 }
  0x4e   : > { %696 = vmatprep.subr.bf16.mxu1 %v808_v1 }
  0x50   : > { %672 = vmatpush1.bf16.msra.mxu0 %v671_v57 }
  0x51   : > { %674 = vmatprep.subr.bf16.mxu0 %v673_v58  ;;  %698 = vmatpush3.bf16.msra.mxu1 %v697_v59 }
  0x52   : > { %699 = vmatprep.subr.bf16.mxu1 %v808_v1 }
  0x54   : > { %676 = vmatpush1.bf16.msra.mxu0 %v675_v3 }
  0x55   : > { %678 = vmatprep.subr.bf16.mxu0 %v677_v4  ;;  %701 = vmatpush3.bf16.msra.mxu1 %v700_v5 }
  0x56   : > { %702 = vmatprep.subr.bf16.mxu1 %v808_v1  ;;  %v306_v1 = vrot.slane %v293_v16, %v305_v18 }
  0x58   : > { %680 = vmatpush1.bf16.msra.mxu0 %v679_v10 }
  0x59   : > { %704 = vmatpush3.bf16.msra.mxu1 %v703_v11 }
  0x5b   : > { %375 = vmatmul.mubr.f32.vlgmr.msra.gmra.mrb[0].mxu0 %v237_v12 }
  0x5c   : > { %647 = vmatmul.mubr.f32.vlgmr.msra.gmra.mrb[0].mxu1 %v237_v12 }
 0x12e   : > { %v376_v21 = vpop.f32.mrb[0].mxu0 }
 0x12f   : > { %v377_v22 = vadd.f32 %v376_v21, %v298_v19  ;;  %v378_v23 = vpop.f32.mrb[1].mxu0  ;;  %v447_v24 = vpop.f32.mrb[0].mxu1 }
 0x130   : > { %v379_v25 = vadd.f32 %v378_v23, %v302_v20  ;;  %v448_v26 = vadd.f32 %v447_v24, %v306_v1  ;;  %v648_v27 = vpop.f32.mrb[1].mxu1 }
 0x131   : > { %v587_v28 = vmul.f32 -1.442695, %v377_v22 }
 0x132   : > { %v457_v29 = vmax.f32 %v379_v25, 0.0 }
 0x133   : > { %745 = vpow2.f32 %v587_v28 }
 0x134   : > { %v458_v30 = vsub.f32 %v457_v29, %v448_v26 }
 0x13d   : > { %v746_v31 = vpop.eup %745 }
 0x13e   : > { %v454_v32 = vadd.f32 1.0, %v746_v31 }
 0x140   : > { %747 = vrcp.f32 %v454_v32 }
 0x147   : > { %464 = sbr.rel (%p588_p8) target bundleno = 336 (0x150), region = 44 }
 0x14a   : > { %v748_v33 = vpop.eup %747 }
 0x14b   : > { %v459_v34 = vmul.f32 %v748_v33, %v458_v30 }
 0x14d   : > { %v460_v35 = vadd.f32 %v459_v34, %v448_v26 }
 0x14f   : > { %471 = vst [vmem:[%s470_s28] sm:$0xff] %v460_v35 }
 0x150 PF: > { %p590_p10 = scmp.ne.s32.totalorder %s795_s12, 2 }
 0x151   : > { %479 = vst [vmem:[%s993_s3] sm:$0xff] (!%p590_p10), %v460_v35 }
 0x152   : > { %475 = sbr.rel (%p590_p10) target bundleno = 345 (0x159), region = 48 }
 0x159 PF: > { %s14_s14 = sadd.s32 1, %s803_s14   ;;  %s1002_s12 = smov %s799_s13 }
 0x15a   : > { %p11_p11 = scmp.ge.s32.totalorder %s14_s14, 5   ;;  %s1003_s13 = smov %s1005_s16 }
 0x15c   :  { %13 = sbr.rel (!%p11_p11) target bundleno = 2 (0x2), region = 84 }
 0x163   :  { %499 = vsyncpa [#allocation4], 1 }
 0x164   :  { %501 = vsyncpa [#allocation4 + $0x1], 1 }

</bundles_post_ra>
